<compile_context>
chip_gen: v7x
topology: tpu7x:2x2x1
jax: 0.10.0
libtpu: 0.0.40
codegen_flags: <defaults>
</compile_context>

<pallas_src>
import functools

import jax
import jax.numpy as jnp
from jax.experimental import pallas as pl
from jax.experimental.pallas import tpu as pltpu


def _pick_tile(total, target):
    """Largest divisor of `total` that is <= target and sublane friendly."""
    for cand in range(min(total, target), 0, -1):
        if total % cand == 0 and (cand % 8 == 0 or cand == total):
            return cand
    return total


def _conv_stats_kernel(xm_ref, xh_ref, w_ref, out_ref, st_ref, *, w_out):
    """Pass 1: 2x2 'same' conv on one row tile + per-tile channel sum / sumsq.

    xm_ref : (TH, W+1, Cin)  padded input rows [h0, h0+TH)
    xh_ref : (1,  W+1, Cin)  halo row h0+TH (bottom 'same' pad row for last tile)
    w_ref  : (4, Cin, Cout)  conv taps in (dh, dw) order
    out_ref: (TH*W, Cout)    conv output tile (f32 intermediate)
    st_ref : (2, Cout)       row 0: sum over tile rows, row 1: sum of squares
    """
    th, _, cin = xm_ref.shape
    cout = out_ref.shape[-1]

    xm = xm_ref[...]
    xh = xh_ref[...]
    rows_dh1 = jnp.concatenate([xm[1:], xh], axis=0) if th > 1 else xh

    # im2col taps sliced in-VMEM (no HBM duplication).  Tap order matches the
    # wrapper weight layout: (dh, dw) = (0,0), (0,1), (1,0), (1,1).
    taps = [rows[:, dw:dw + w_out, :].reshape(th * w_out, cin)
            for rows in (xm, rows_dh1) for dw in (0, 1)]

    if cin % 128 == 0:
        # Lane-aligned channels: fold taps into ONE matmul with K = 4*Cin
        # (fewer MXU push/drain sequences, better systolic occupancy).
        xcol = jnp.concatenate(taps, axis=-1)
        acc = jnp.dot(xcol, w_ref[...].reshape(4 * cin, cout),
                      preferred_element_type=jnp.float32)
    else:
        # Tiny / unaligned Cin (test case Cin=4): per-tap matmuls, f32 acc.
        acc = jnp.zeros((th * w_out, cout), jnp.float32)
        for k in range(4):
            acc = acc + jnp.dot(taps[k], w_ref[k],
                                preferred_element_type=jnp.float32)

    out_ref[...] = acc
    st_ref[0:1, :] = jnp.sum(acc, axis=0, keepdims=True)
    st_ref[1:2, :] = jnp.sum(acc * acc, axis=0, keepdims=True)


def _affine_kernel(x_ref, s_ref, b_ref, o_ref):
    """Pass 2: y = x * scale + shift (BN folded into a per-channel affine)."""
    o_ref[...] = (x_ref[...] * s_ref[...] + b_ref[...]).astype(o_ref.dtype)


def conv2d_block_forward(x_nchw, conv_weight, bn_gamma, bn_beta, *, eps=1e-5,
                         pool=False):
    """Forward of Conv2dBlock(in_ch, out_ch, kernel_size=(2,2), stride=1,
    dilation=1, padding='same', normalize=True, pool=pool). Conv has no bias."""
    N, Cin, H, W = x_nchw.shape
    Cout, Cin_w, KH, KW = conv_weight.shape
    assert Cin == Cin_w
    assert (KH, KW) == (2, 2), "module default kernel_size=(2,2) only"
    # TODO(synk): only the module defaults stride=1 / dilation=1 / padding='same'
    # are implemented in the kernel path.

    # NCHW -> NHWC, single asymmetric 'same' pad (extra row/col bottom/right).
    x = jnp.transpose(x_nchw, (0, 2, 3, 1))
    xp = jnp.pad(x, ((0, 0), (0, 1), (0, 1), (0, 0)))          # (N, H+1, W+1, Cin)

    # Conv taps -> (4, Cin, Cout) in (dh, dw) order; native dtype for the MXU.
    w_taps = jnp.transpose(conv_weight, (2, 3, 1, 0)).reshape(KH * KW, Cin, Cout)
    w_taps = w_taps.astype(x_nchw.dtype)

    # ---- pass 1: tiled conv + per-tile BN partial sums ----------------------
    th = 1
    for cand in range(H, 0, -1):
        if H % cand == 0 and cand * W <= 2048:                  # ~row-tile target
            th = cand
            break
    gh = H // th
    wp = W + 1

    conv_out, stats = pl.pallas_call(
        functools.partial(_conv_stats_kernel, w_out=W),
        out_shape=(
            jax.ShapeDtypeStruct((N, gh, th * W, Cout), jnp.float32),
            jax.ShapeDtypeStruct((N, gh, 2, Cout), jnp.float32),
        ),
        grid=(N, gh),
        in_specs=[
            # Row tile and its 1-row halo are two views of the SAME padded array.
            pl.BlockSpec((None, th, wp, Cin), lambda n, i: (n, i, 0, 0)),
            pl.BlockSpec((None, 1, wp, Cin), lambda n, i: (n, (i + 1) * th, 0, 0)),
            pl.BlockSpec((KH * KW, Cin, Cout), lambda n, i: (0, 0, 0)),
        ],
        out_specs=(
            pl.BlockSpec((None, None, th * W, Cout), lambda n, i: (n, i, 0, 0)),
            pl.BlockSpec((None, None, 2, Cout), lambda n, i: (n, i, 0, 0)),
        ),
        compiler_params=pltpu.CompilerParams(
            dimension_semantics=("parallel", "parallel"),
            vmem_limit_bytes=32 * 1024 * 1024,
        ),
    )(xp, xp, w_taps)

    # ---- global BN stats from tiny per-tile partials (wrapper-side, f32) ----
    m_rows = N * H * W
    tot = jnp.sum(stats, axis=(0, 1))                            # (2, Cout)
    mean = tot[0] / m_rows
    var = tot[1] / m_rows - mean * mean                          # biased batch var
    inv = jax.lax.rsqrt(var + eps)
    scale = bn_gamma.astype(jnp.float32) * inv
    shift = bn_beta.astype(jnp.float32) - mean * scale

    # ---- pass 2: lane-dense tiled affine normalize --------------------------
    conv_flat = conv_out.reshape(m_rows, Cout)
    if (m_rows * Cout) % 128 == 0 and 128 % Cout == 0:
        # Reinterpret the (M, Cout) intermediate as 128-wide rows so loads and
        # stores are unmasked, full-lane vst/vld; scale/shift are tiled to match.
        c2 = 128
        r2 = m_rows * Cout // c2
        x2 = conv_flat.reshape(r2, c2)
        rep = c2 // Cout
        s2 = jnp.tile(scale, rep).reshape(1, c2)
        b2 = jnp.tile(shift, rep).reshape(1, c2)
    else:
        r2, c2 = m_rows, Cout
        x2 = conv_flat
        s2 = scale.reshape(1, Cout)
        b2 = shift.reshape(1, Cout)

    tm2 = _pick_tile(r2, 1024)
    y2 = pl.pallas_call(
        _affine_kernel,
        out_shape=jax.ShapeDtypeStruct((r2, c2), x_nchw.dtype),
        grid=(r2 // tm2,),
        in_specs=[
            pl.BlockSpec((tm2, c2), lambda i: (i, 0)),
            pl.BlockSpec((1, c2), lambda i: (0, 0)),
            pl.BlockSpec((1, c2), lambda i: (0, 0)),
        ],
        out_specs=pl.BlockSpec((tm2, c2), lambda i: (i, 0)),
        compiler_params=pltpu.CompilerParams(
            dimension_semantics=("parallel",),
            vmem_limit_bytes=32 * 1024 * 1024,
        ),
    )(x2, s2, b2)

    out = jnp.transpose(y2.reshape(N, H, W, Cout), (0, 3, 1, 2))  # back to NCHW

    if pool:
        # TODO(synk): MaxPool2d((2,2)) kept as plain-JAX glue (module default
        # config has pool=False, so this path is not exercised).
        out = out[:, :, : (H // 2) * 2, : (W // 2) * 2]
        out = out.reshape(N, Cout, H // 2, 2, W // 2, 2).max(axis=(3, 5))
    return out


def _reference(x_nchw, w, gamma, beta, eps=1e-5):
    """Pure-JAX reference of the same forward, for a correctness check."""
    N, Cin, H, W = x_nchw.shape
    Cout = w.shape[0]
    xp = jnp.pad(x_nchw, ((0, 0), (0, 0), (0, 1), (0, 1)))
    out = jnp.zeros((N, Cout, H, W), jnp.float32)
    for dh in range(2):
        for dw in range(2):
            out = out + jnp.einsum(
                "nchw,oc->nohw", xp[:, :, dh:dh + H, dw:dw + W], w[:, :, dh, dw]
            )
    mean = out.mean(axis=(0, 2, 3), keepdims=True)
    var = jnp.square(out - mean).mean(axis=(0, 2, 3), keepdims=True)
    return (out - mean) / jnp.sqrt(var + eps) * gamma.reshape(1, -1, 1, 1) + beta.reshape(
        1, -1, 1, 1
    )


if __name__ == "__main__":
    key = jax.random.PRNGKey(0)
    kx, kw, kg, kb = jax.random.split(key, 4)
    N, Cin, Cout, H, W = 2, 4, 8, 16, 16

    x = jax.random.normal(kx, (N, Cin, H, W), jnp.float32)
    # Parameter shapes from the module's __init__ (synthetic, deterministic init):
    conv_w = 0.1 * jax.random.normal(kw, (Cout, Cin, 2, 2), jnp.float32)   # Conv2d.weight
    bn_gamma = 1.0 + 0.1 * jax.random.normal(kg, (Cout,), jnp.float32)     # BatchNorm2d.weight
    bn_beta = 0.1 * jax.random.normal(kb, (Cout,), jnp.float32)            # BatchNorm2d.bias

    out = jax.block_until_ready(conv2d_block_forward(x, conv_w, bn_gamma, bn_beta))
    ref = _reference(x, conv_w, bn_gamma, bn_beta)

    assert out.shape == (N, Cout, H, W), out.shape
    assert jnp.allclose(out, ref, atol=1e-4, rtol=1e-4), "mismatch vs pure-JAX reference"
    print("KERNEL_OK")
</pallas_src>

<mosaic_0001>
module attributes {stable_mosaic.version = 11 : i64} {
  func.func @_conv_stats_kernel(%arg0: i32, %arg1: i32, %arg2: memref<1x16x17x4xf32, #tpu.memory_space<vmem>>, %arg3: memref<1x1x17x4xf32, #tpu.memory_space<vmem>>, %arg4: memref<4x4x8xf32, #tpu.memory_space<vmem>>, %arg5: memref<1x1x256x8xf32, #tpu.memory_space<vmem>>, %arg6: memref<1x1x2x8xf32, #tpu.memory_space<vmem>>) attributes {dimension_semantics = [#tpu.dimension_semantics<parallel>, #tpu.dimension_semantics<parallel>], iteration_bounds = array<i64: 2, 1>, scalar_prefetch = 0 : i64, scratch_operands = 0 : i64, tpu.core_type = #tpu.core_type<tc>, window_params = [{transform_indices = @transform_0, window_bounds = array<i64: 1, 16, 17, 4>}, {transform_indices = @transform_1, window_bounds = array<i64: 1, 1, 17, 4>}, {pipeline_mode = #tpu.pipeline_mode<synchronous>, transform_indices = @transform_2, window_bounds = array<i64: 4, 4, 8>}, {transform_indices = @transform_3, window_bounds = array<i64: 1, 1, 256, 8>}, {transform_indices = @transform_4, window_bounds = array<i64: 1, 1, 2, 8>}]} {
    %c0 = arith.constant 0 : index
    %c0_0 = arith.constant 0 : index
    %c0_1 = arith.constant 0 : index
    %c0_2 = arith.constant 0 : index
    %0 = vector.load %arg2[%c0, %c0_0, %c0_1, %c0_2] : memref<1x16x17x4xf32, #tpu.memory_space<vmem>>, vector<1x16x17x4xf32>
    %1 = vector.shape_cast %0 : vector<1x16x17x4xf32> to vector<16x17x4xf32>
    %c0_3 = arith.constant 0 : index
    %c0_4 = arith.constant 0 : index
    %c0_5 = arith.constant 0 : index
    %c0_6 = arith.constant 0 : index
    %2 = vector.load %arg3[%c0_3, %c0_4, %c0_5, %c0_6] : memref<1x1x17x4xf32, #tpu.memory_space<vmem>>, vector<1x1x17x4xf32>
    %3 = vector.shape_cast %2 : vector<1x1x17x4xf32> to vector<1x17x4xf32>
    %4 = vector.extract_strided_slice %1 {offsets = [1, 0, 0], sizes = [15, 17, 4], strides = [1, 1, 1]} : vector<16x17x4xf32> to vector<15x17x4xf32>
    %5 = tpu.concatenate %4, %3 in 0 : vector<15x17x4xf32>, vector<1x17x4xf32> -> vector<16x17x4xf32>
    %6 = vector.extract_strided_slice %1 {offsets = [0, 0, 0], sizes = [16, 16, 4], strides = [1, 1, 1]} : vector<16x17x4xf32> to vector<16x16x4xf32>
    %7 = vector.shape_cast %6 : vector<16x16x4xf32> to vector<256x4xf32>
    %8 = vector.extract_strided_slice %1 {offsets = [0, 1, 0], sizes = [16, 16, 4], strides = [1, 1, 1]} : vector<16x17x4xf32> to vector<16x16x4xf32>
    %9 = vector.shape_cast %8 : vector<16x16x4xf32> to vector<256x4xf32>
    %10 = vector.extract_strided_slice %5 {offsets = [0, 0, 0], sizes = [16, 16, 4], strides = [1, 1, 1]} : vector<16x17x4xf32> to vector<16x16x4xf32>
    %11 = vector.shape_cast %10 : vector<16x16x4xf32> to vector<256x4xf32>
    %12 = vector.extract_strided_slice %5 {offsets = [0, 1, 0], sizes = [16, 16, 4], strides = [1, 1, 1]} : vector<16x17x4xf32> to vector<16x16x4xf32>
    %13 = vector.shape_cast %12 : vector<16x16x4xf32> to vector<256x4xf32>
    %cst = arith.constant 0.000000e+00 : f32
    %14 = vector.broadcast %cst : f32 to vector<256x8xf32>
    %c0_7 = arith.constant 0 : index
    %c0_8 = arith.constant 0 : index
    %c0_9 = arith.constant 0 : index
    %15 = vector.load %arg4[%c0_7, %c0_8, %c0_9] : memref<4x4x8xf32, #tpu.memory_space<vmem>>, vector<1x4x8xf32>
    %16 = vector.shape_cast %15 : vector<1x4x8xf32> to vector<4x8xf32>
    %cst_10 = arith.constant dense<0.000000e+00> : vector<256x8xf32>
    %17 = tpu.matmul %7, %16, %cst_10 {dimension_numbers = #tpu.dot_dimension_numbers<[1], [0], [0], [1], [0, 0, 1, 1], [], []>} : vector<256x4xf32>, vector<4x8xf32>, vector<256x8xf32> -> vector<256x8xf32>
    %18 = arith.addf %14, %17 : vector<256x8xf32>
    %c1 = arith.constant 1 : index
    %c0_11 = arith.constant 0 : index
    %c0_12 = arith.constant 0 : index
    %19 = vector.load %arg4[%c1, %c0_11, %c0_12] : memref<4x4x8xf32, #tpu.memory_space<vmem>>, vector<1x4x8xf32>
    %20 = vector.shape_cast %19 : vector<1x4x8xf32> to vector<4x8xf32>
    %cst_13 = arith.constant dense<0.000000e+00> : vector<256x8xf32>
    %21 = tpu.matmul %9, %20, %cst_13 {dimension_numbers = #tpu.dot_dimension_numbers<[1], [0], [0], [1], [0, 0, 1, 1], [], []>} : vector<256x4xf32>, vector<4x8xf32>, vector<256x8xf32> -> vector<256x8xf32>
    %22 = arith.addf %18, %21 : vector<256x8xf32>
    %c2 = arith.constant 2 : index
    %c0_14 = arith.constant 0 : index
    %c0_15 = arith.constant 0 : index
    %23 = vector.load %arg4[%c2, %c0_14, %c0_15] : memref<4x4x8xf32, #tpu.memory_space<vmem>>, vector<1x4x8xf32>
    %24 = vector.shape_cast %23 : vector<1x4x8xf32> to vector<4x8xf32>
    %cst_16 = arith.constant dense<0.000000e+00> : vector<256x8xf32>
    %25 = tpu.matmul %11, %24, %cst_16 {dimension_numbers = #tpu.dot_dimension_numbers<[1], [0], [0], [1], [0, 0, 1, 1], [], []>} : vector<256x4xf32>, vector<4x8xf32>, vector<256x8xf32> -> vector<256x8xf32>
    %26 = arith.addf %22, %25 : vector<256x8xf32>
    %c3 = arith.constant 3 : index
    %c0_17 = arith.constant 0 : index
    %c0_18 = arith.constant 0 : index
    %27 = vector.load %arg4[%c3, %c0_17, %c0_18] : memref<4x4x8xf32, #tpu.memory_space<vmem>>, vector<1x4x8xf32>
    %28 = vector.shape_cast %27 : vector<1x4x8xf32> to vector<4x8xf32>
    %cst_19 = arith.constant dense<0.000000e+00> : vector<256x8xf32>
    %29 = tpu.matmul %13, %28, %cst_19 {dimension_numbers = #tpu.dot_dimension_numbers<[1], [0], [0], [1], [0, 0, 1, 1], [], []>} : vector<256x4xf32>, vector<4x8xf32>, vector<256x8xf32> -> vector<256x8xf32>
    %30 = arith.addf %26, %29 : vector<256x8xf32>
    %c0_20 = arith.constant 0 : index
    %c0_21 = arith.constant 0 : index
    %c0_22 = arith.constant 0 : index
    %c0_23 = arith.constant 0 : index
    %31 = vector.load %arg5[%c0_20, %c0_21, %c0_22, %c0_23] : memref<1x1x256x8xf32, #tpu.memory_space<vmem>>, vector<1x1x256x8xf32>
    %32 = vector.shape_cast %31 : vector<1x1x256x8xf32> to vector<256x8xf32>
    %33 = vector.shape_cast %30 : vector<256x8xf32> to vector<1x1x256x8xf32>
    tpu.vector_store %arg5[%c0_20, %c0_21, %c0_22, %c0_23], %33 {strides = array<i32>} : memref<1x1x256x8xf32, #tpu.memory_space<vmem>>, vector<1x1x256x8xf32>,
    %cst_24 = arith.constant dense<0.000000e+00> : vector<8xf32>
    %34 = vector.multi_reduction <add>, %30, %cst_24 [0] : vector<256x8xf32> to vector<8xf32>
    %35 = vector.shape_cast %34 : vector<8xf32> to vector<1x8xf32>
    %c0_25 = arith.constant 0 : index
    %c0_26 = arith.constant 0 : index
    %c0_27 = arith.constant 0 : index
    %c0_28 = arith.constant 0 : index
    %36 = vector.load %arg6[%c0_25, %c0_26, %c0_27, %c0_28] : memref<1x1x2x8xf32, #tpu.memory_space<vmem>>, vector<1x1x1x8xf32>
    %37 = vector.shape_cast %36 : vector<1x1x1x8xf32> to vector<1x8xf32>
    %38 = vector.shape_cast %35 : vector<1x8xf32> to vector<1x1x1x8xf32>
    tpu.vector_store %arg6[%c0_25, %c0_26, %c0_27, %c0_28], %38 {strides = array<i32>} : memref<1x1x2x8xf32, #tpu.memory_space<vmem>>, vector<1x1x1x8xf32>,
    %39 = arith.mulf %30, %30 : vector<256x8xf32>
    %cst_29 = arith.constant dense<0.000000e+00> : vector<8xf32>
    %40 = vector.multi_reduction <add>, %39, %cst_29 [0] : vector<256x8xf32> to vector<8xf32>
    %41 = vector.shape_cast %40 : vector<8xf32> to vector<1x8xf32>
    %c0_30 = arith.constant 0 : index
    %c0_31 = arith.constant 0 : index
    %c1_32 = arith.constant 1 : index
    %c0_33 = arith.constant 0 : index
    %42 = vector.load %arg6[%c0_30, %c0_31, %c1_32, %c0_33] : memref<1x1x2x8xf32, #tpu.memory_space<vmem>>, vector<1x1x1x8xf32>
    %43 = vector.shape_cast %42 : vector<1x1x1x8xf32> to vector<1x8xf32>
    %44 = vector.shape_cast %41 : vector<1x8xf32> to vector<1x1x1x8xf32>
    tpu.vector_store %arg6[%c0_30, %c0_31, %c1_32, %c0_33], %44 {strides = array<i32>} : memref<1x1x2x8xf32, #tpu.memory_space<vmem>>, vector<1x1x1x8xf32>,
    return
  }
  func.func @transform_0(%arg0: i32, %arg1: i32) -> (i32, i32, i32, i32) {
    %c0_i32 = arith.constant 0 : i32
    %c0_i32_0 = arith.constant 0 : i32
    %c0_i32_1 = arith.constant 0 : i32
    return %arg0, %arg1, %c0_i32, %c0_i32_0 : i32, i32, i32, i32
  }
  func.func @transform_1(%arg0: i32, %arg1: i32) -> (i32, i32, i32, i32) {
    %c1_i32 = arith.constant 1 : i32
    %0 = arith.addi %arg1, %c1_i32 : i32
    %c16_i32 = arith.constant 16 : i32
    %1 = arith.muli %0, %c16_i32 : i32
    %c0_i32 = arith.constant 0 : i32
    %c0_i32_0 = arith.constant 0 : i32
    %c0_i32_1 = arith.constant 0 : i32
    return %arg0, %1, %c0_i32, %c0_i32_0 : i32, i32, i32, i32
  }
  func.func @transform_2(%arg0: i32, %arg1: i32) -> (i32, i32, i32) {
    %c0_i32 = arith.constant 0 : i32
    %c0_i32_0 = arith.constant 0 : i32
    %c0_i32_1 = arith.constant 0 : i32
    %c0_i32_2 = arith.constant 0 : i32
    return %c0_i32, %c0_i32_0, %c0_i32_1 : i32, i32, i32
  }
  func.func @transform_3(%arg0: i32, %arg1: i32) -> (i32, i32, i32, i32) {
    %c0_i32 = arith.constant 0 : i32
    %c0_i32_0 = arith.constant 0 : i32
    %c0_i32_1 = arith.constant 0 : i32
    return %arg0, %arg1, %c0_i32, %c0_i32_0 : i32, i32, i32, i32
  }
  func.func @transform_4(%arg0: i32, %arg1: i32) -> (i32, i32, i32, i32) {
    %c0_i32 = arith.constant 0 : i32
    %c0_i32_0 = arith.constant 0 : i32
    %c0_i32_1 = arith.constant 0 : i32
    return %arg0, %arg1, %c0_i32, %c0_i32_0 : i32, i32, i32, i32
  }
}

</mosaic_0001>

<bundles_post_ra>
// kernel: tpu_custom_call.1
= control target key start
LH: loop header
LB: loop body
LE: loop exit
PB: predicated region body
PF: predicated region fallthrough
CT: control target
= control target key end

     0   :  { %10 = vsyncpa [#allocation3], 0  ;;  %s3528_s0 = inlined_call_operand.vmem [shape: f32[2,17,17,4], index: 0, kind: input, shape index: {}]   ;;  %s3529_s1 = inlined_call_operand.vmem [shape: f32[2,17,17,4], index: 1, kind: input, shape index: {}]   ;;  %s3530_s2 = inlined_call_operand.vmem [shape: f32[4,4,8], index: 2, kind: input, shape index: {}]   ;;  %s3531_s3 = inlined_call_operand.vmem [shape: f32[2,1,256,8], index: 3, kind: output, shape index: {0}]   ;;  %s3532_s4 = inlined_call_operand.hbm [shape: f32[2,1,2,8], index: 4, kind: output, shape index: {1}]  }
   0x1   :  { %12 = vsyncpa [#allocation3 + $0x1], 0  ;;  %s2750_s15 = smov 0   ;;  %s2752_s16 = smov 0  }
   0x2   :  { %s2754_s17 = smov 0   ;;  %s2756_s18 = smov 0  }
   0x3   :  { %s2758_s19 = smov 0   ;;  %s2760_s20 = smov 0  }
   0x4 LB: > { %s2006_s21 = sadd.s32 4294967295, %s2722_s20   ;;  %s2007_s22 = sadd.s32 4294967294, %s2722_s20   ;;  %s2722_s20 = sphi %s2760_s20, %s18_s20   ;;  %s2718_s19 = sphi %s2758_s19, %s3561_s19   ;;  %s2714_s18 = sphi %s2756_s18, %s3560_s18   ;;  %s2710_s17 = sphi %s2754_s17, %s3559_s17   ;;  %s2706_s16 = sphi %s2752_s16, %s3558_s16   ;;  %s2702_s15 = sphi %s2750_s15, %s3557_s15  }
   0x5   : > { %s30_s23 = sadd.s32 1, %s2718_s19  ;;  %s148_s24 = sadd.s32 1, %s2710_s17 }
   0x6   : > { %p32_p0 = scmp.ge.s32.totalorder %s30_s23, 2  ;;  %p158_p1 = scmp.ne.s32.totalorder %s2710_s17, %s2706_s16 }
   0x7   : > { %p159_p2 = scmp.eq.s32.totalorder %s2006_s21, 1  ;;  %p164_p3 = scmp.ne.s32.totalorder %s2706_s16, %s2702_s15 }
   0x8   : > { %s3563_s23 = smov (%p32_p0, %s30_s23), 0  ;;  %p165_p5 = scmp.eq.s32.totalorder %s2007_s22, 1 }
   0x9   : > { %p2790_p4 = por %p159_p2, %p158_p1  ;;  %s143_s26 = ssub.s32 %s2718_s19, %s3563_s23 }
   0xa   : > { %p2010_p6 = scmp.ge.s32.totalorder %s2722_s20, 1  ;;  %p146_p7 = scmp.eq.s32.totalorder %s143_s26, 0 }
   0xb   : > { %p2797_p8 = por %p165_p5, %p164_p3  ;;  %p226_p9 = scmp.lt.s32.totalorder %s2722_s20, 3 }
   0xc   : > { %s2803_s28 = scalar_select %p146_p7, %s2710_s17, %s148_s24  }
   0xd   : > { %p227_p10 = pnand %p2010_p6, %p226_p9 }
   0xf   : > { %230 = sbr.rel (%p227_p10) target bundleno = 407 (0x197), region = 32 }
  0x16   : > { %vm581_vm0 = vcmask 1043456   ;;  %v2083_v0 = vld [vmem:[%s3530_s2 + $0x8] sm:$0xf]  ;;  %p288_p11 = scmp.lt.s32.totalorder %s2714_s18, 1  ;;  %v2016_v1 = vld [vmem:[%s3530_s2 + $0x4] sm:$0xf] }
  0x17   : > { %2390 = vmatprep.subr.msk.mxu0 %vm581_vm0, %v2083_v0  ;;  %v513_v2 = vld [vmem:[%s3530_s2] sm:$0xf]  ;;  %v2117_v3 = vld [vmem:[%s3530_s2 + $0xc] sm:$0xf]  ;;  %2290 = vmatprep.subr.msk.mxu1 %vm581_vm0, %v2016_v1  ;;  %vm516_vm1 = vcmask 31744   ;;  %vm424_vm2 = vcmask 1046528  }
  0x18   : > { %2391 = vmatpush3.msk.msra.mxu0 %vm581_vm0, %v2083_v0  ;;  %s2821_s11 = scalar_select %p288_p11, %s2714_s18, 1  ;;  %2291 = vmatpush3.msk.msra.mxu1 %vm581_vm0, %v2016_v1  ;;  %vm1634_vm3 = vcmask 64512   ;;  %vm1736_vm4 = vcmask 57344  }
  0x19   : > { %2440 = vmatprep.subr.msk.mxu0 %vm581_vm0, %v2117_v3  ;;  %2340 = vmatprep.subr.msk.mxu1 %vm581_vm0, %v513_v2  ;;  %s279_s8 = sand.u32 1, %s2706_s16   ;;  %s2152_s10 = sshll.u32 %s2714_s18, 5 }
  0x1a   : > { %s2586_s12 = smul.u32 408, %s2821_s11  ;;  %s2157_s30 = sshll.u32 %s2821_s11, 8 }
  0x1b   : > { %s3346_s7 = scalar_lea.vmem %s3531_s3, %s2157_s30  ;;  %s2011_s9 = sshll.u32 %s279_s8, 1 }
  0x1c   : > { %s2833_s21 = scalar_lea.vmem %s3528_s0, %s2586_s12  ;;  %s2156_s22 = sadd.s32 384, %s2586_s12 }
  0x1d   : > { %v2836_v4 = vld [vmem:[%s2833_s21 + $0x18] sm:$0xff]  ;;  %v2839_v5 = vld [vmem:[%s2833_s21 + $0x20] sm:$0xff]  ;;  %v2849_v9 = vld [vmem:[%s2833_s21 + $0x8] sm:$0xff]  ;;  %s2952_s29 = scalar_lea.vmem %s3529_s1, %s2156_s22  ;;  %s281_s11 = scalar_lea.vmem [#allocation2], %s2011_s9 }
  0x1e   : > { %v2842_v6 = vld [vmem:[%s2833_s21] sm:$0xff]  ;;  %v430_v7 = vrot.slane %v2836_v4, 1  ;;  %2392 = vmatprep.mubr.msk.f32.mxu0 %vm516_vm1, %v2836_v4  ;;  %v431_v8 = vrot.slane %v2839_v5, 1  ;;  %v327_v11 = vld [vmem:[%s2833_s21 + $0x10] sm:$0x1]  ;;  %v426_v12 = vrot.slane %v2849_v9, 1 }
  0x1f   : > { %v425_v10 = vrot.slane %v2842_v6, 1  ;;  %2393 = vmatmul.mubr.msk.f32.vlgmr.msra.gmra.mrb[0].mxu0 %vm516_vm1, %v2839_v5  ;;  %v428_v13 = vrot.slane %v327_v11, 1  ;;  %v2857_v14 = vld [vmem:[%s2833_s21 + $0x30] sm:$0xff]  ;;  %v330_v15 = vld [vmem:[%s2833_s21 + $0x28] sm:$0x1]  ;;  %v2865_v17 = vld [vmem:[%s2833_s21 + $0x38] sm:$0xff] }
  0x20   : > { %v435_v16 = vrot.slane %v2857_v14, 1  ;;  %2395 = vmatprep.mubr.msk.f32.mxu0 %vm516_vm1, %v2857_v14  ;;  %2441 = vmatpush3.msk.msra.mxu0 %vm581_vm0, %v2117_v3  ;;  %v433_v18 = vrot.slane %v330_v15, 1  ;;  %v436_v21 = vrot.slane %v2865_v17, 1  ;;  %v2871_v22 = vsel %vm424_vm2, %v430_v7, %v431_v8  ;;  %v333_v23 = vld [vmem:[%s2833_s21 + $0x40] sm:$0x1]  ;;  %v2876_v24 = vld [vmem:[%s2833_s21 + $0x48] sm:$0xff] }
  0x21   : > { %v427_v19 = vsel %vm424_vm2, %v425_v10, %v426_v12  ;;  %v429_v20 = vsel %vm424_vm2, %v426_v12, %v428_v13  ;;  %v2888_v26 = vld [vmem:[%s2833_s21 + $0x50] sm:$0xff]  ;;  %v438_v27 = vrot.slane %v333_v23, 1  ;;  %v440_v28 = vrot.slane %v2876_v24, 1  ;;  %v2898_v31 = vld [vmem:[%s2833_s21 + $0x60] sm:$0xff]  ;;  %v336_v32 = vld [vmem:[%s2833_s21 + $0x58] sm:$0x1] }
  0x22   : > { %2292 = vmatprep.mubr.msk.f32.mxu1 %vm516_vm1, %v427_v19  ;;  %v2885_v25 = vsel %vm424_vm2, %v431_v8, %v433_v18  ;;  %v441_v29 = vrot.slane %v2888_v26, 1  ;;  %v2895_v30 = vsel %vm424_vm2, %v435_v16, %v436_v21  ;;  %v2913_v34 = vld [vmem:[%s2833_s21 + $0x68] sm:$0xff]  ;;  %v443_v35 = vrot.slane %v336_v32, 1  ;;  %v2921_v39 = vld [vmem:[%s2833_s21 + $0x78] sm:$0xff]  ;;  %v339_v40 = vld [vmem:[%s2833_s21 + $0x70] sm:$0x1] }
  0x23   : > { %2293 = vmatmul.mubr.msk.f32.vlgmr.msra.gmra.mrb[0].mxu1 %vm516_vm1, %v429_v20  ;;  %2396 = vmatmul.mubr.msk.f32.gmra.mrb[2].mxu0 %vm516_vm1, %v2865_v17  ;;  %v2908_v33 = vsel %vm424_vm2, %v436_v21, %v438_v27  ;;  %v445_v36 = vrot.slane %v2898_v31, 1  ;;  %v446_v37 = vrot.slane %v2913_v34, 1  ;;  %v2938_v42 = vld [vmem:[%s2833_s21 + $0x80] sm:$0xff]  ;;  %v448_v43 = vrot.slane %v339_v40, 1  ;;  %v2946_v47 = vld [vmem:[%s2833_s21 + $0x90] sm:$0xff]  ;;  %v2967_v51 = vld [vmem:[%s2833_s21 + $0x98] sm:$0xff] }
  0x24   : > { %2341 = vmatpush3.msk.msra.mxu1 %vm581_vm0, %v513_v2  ;;  %2295 = vmatprep.mubr.msk.f32.mxu1 %vm516_vm1, %v2871_v22  ;;  %v2918_v38 = vsel %vm424_vm2, %v440_v28, %v441_v29  ;;  %v2933_v41 = vsel %vm424_vm2, %v441_v29, %v443_v35  ;;  %v450_v44 = vrot.slane %v2921_v39, 1  ;;  %v451_v45 = vrot.slane %v2938_v42, 1  ;;  %v342_v48 = vld [vmem:[%s2833_s21 + $0x88] sm:$0x1]  ;;  %v375_v49 = vld [vmem:[%s2952_s29 + $0x10] sm:$0x1] }
  0x25   : > { %2398 = vmatprep.mubr.msk.f32.mxu0 %vm516_vm1, %v2876_v24  ;;  %v2943_v46 = vsel %vm424_vm2, %v445_v36, %v446_v37  ;;  %v2962_v50 = vsel %vm424_vm2, %v446_v37, %v448_v43  ;;  %v453_v52 = vrot.slane %v342_v48, 1  ;;  %v455_v53 = vrot.slane %v2946_v47, 1  ;;  %v2975_v56 = vld [vmem:[%s2833_s21 + $0xa8] sm:$0xff]  ;;  %v345_v57 = vld [vmem:[%s2833_s21 + $0xa0] sm:$0x1]  ;;  %v2994_v62 = vld [vmem:[%s2833_s21 + $0xb0] sm:$0xff] }
  0x26   : > { %v456_v54 = vrot.slane %v2967_v51, 1  ;;  %v2972_v55 = vsel %vm424_vm2, %v450_v44, %v451_v45  ;;  %v2979_v58 = vld [vmem:[%s2952_s29 + $0x8] sm:$0xff]  ;;  %v511_v60 = vrot.slane %v375_v49, 1  ;;  %v458_v63 = vrot.slane %v345_v57, 1  ;;  %v3007_v7 = vld [vmem:[%s2833_s21 + $0xc0] sm:$0xff]  ;;  %v3030_v18 = vld [vmem:[%s2833_s21 + $0xd8] sm:$0xff] }
  0x27   : > { %2296 = vmatmul.mubr.msk.f32.gmra.mrb[2].mxu1 %vm516_vm1, %v2885_v25  ;;  %2399 = vmatmul.mubr.msk.f32.gmra.mrb[4].mxu0 %vm516_vm1, %v2888_v26  ;;  %v3533_v59 = vrot.slane %v2979_v58, 1  ;;  %v2989_v61 = vsel %vm424_vm2, %v451_v45, %v453_v52  ;;  %v460_v1 = vrot.slane %v2975_v56, 1  ;;  %v461_v2 = vrot.slane %v2994_v62, 1  ;;  %v348_v8 = vld [vmem:[%s2833_s21 + $0xb8] sm:$0x1]  ;;  %v3022_v11 = vld [vmem:[%s2833_s21 + $0xc8] sm:$0xff] }
  0x28   : > { %2298 = vmatprep.mubr.msk.f32.mxu1 %vm516_vm1, %v2895_v30  ;;  %2401 = vmatprep.mubr.msk.f32.mxu0 %vm516_vm1, %v2898_v31  ;;  %v3004_v3 = vsel %vm424_vm2, %v455_v53, %v456_v54  ;;  %v3017_v10 = vsel %vm424_vm2, %v456_v54, %v458_v63  ;;  %v463_v12 = vrot.slane %v348_v8, 1  ;;  %v465_v13 = vrot.slane %v3007_v7, 1  ;;  %v351_v19 = vld [vmem:[%s2833_s21 + $0xd0] sm:$0x1]  ;;  %v3045_v21 = vld [vmem:[%s2833_s21 + $0xe0] sm:$0xff]  ;;  %v3068_v37 = vld [vmem:[%s2833_s21 + $0xf8] sm:$0xff] }
  0x29   : > { %v2999_v0 = vsel %vm424_vm2, %v3533_v59, %v511_v60  ;;  %v466_v15 = vrot.slane %v3022_v11, 1  ;;  %v3027_v16 = vsel %vm424_vm2, %v460_v1, %v461_v2  ;;  %v468_v23 = vrot.slane %v351_v19, 1  ;;  %v3053_v32 = vld [vmem:[%s2833_s21 + $0xf0] sm:$0xff]  ;;  %v354_v35 = vld [vmem:[%s2833_s21 + $0xe8] sm:$0x1]  ;;  %v3099_v1 = vld [vmem:[%s2833_s21 + $0x120] sm:$0xff] }
  0x2a   : > { %3542 = vst [vmem:[#allocation5_spill] sm:$0xff] %v2999_v0  ;;  %v3040_v20 = vsel %vm424_vm2, %v461_v2, %v463_v12  ;;  %v470_v27 = vrot.slane %v3030_v18, 1  ;;  %v471_v28 = vrot.slane %v3045_v21, 1  ;;  %v473_v40 = vrot.slane %v354_v35, 1  ;;  %v3076_v48 = vld [vmem:[%s2833_s21 + $0x108] sm:$0xff]  ;;  %v3091_v53 = vld [vmem:[%s2833_s21 + $0x110] sm:$0xff] }
  0x2b   : > { %2299 = vmatmul.mubr.msk.f32.gmra.mrb[4].mxu1 %vm516_vm1, %v2908_v33  ;;  %2402 = vmatmul.mubr.msk.f32.gmra.mrb[6].mxu0 %vm516_vm1, %v2913_v34  ;;  %v3050_v29 = vsel %vm424_vm2, %v465_v13, %v466_v15  ;;  %v3063_v36 = vsel %vm424_vm2, %v466_v15, %v468_v23  ;;  %v475_v43 = vrot.slane %v3053_v32, 1  ;;  %v476_v44 = vrot.slane %v3068_v37, 1  ;;  %v357_v49 = vld [vmem:[%s2833_s21 + $0x100] sm:$0x1]  ;;  %3543 = vst [vmem:[#allocation6_spill] sm:$0xff] %v3099_v1  ;;  %v3114_v12 = vld [vmem:[%s2833_s21 + $0x128] sm:$0xff] }
  0x2c   : > { %2301 = vmatprep.mubr.msk.f32.mxu1 %vm516_vm1, %v2918_v38  ;;  %2404 = vmatprep.mubr.msk.f32.mxu0 %vm516_vm1, %v2921_v39  ;;  %v3073_v45 = vsel %vm424_vm2, %v470_v27, %v471_v28  ;;  %v3086_v52 = vsel %vm424_vm2, %v471_v28, %v473_v40  ;;  %v478_v54 = vrot.slane %v357_v49, 1  ;;  %v480_v57 = vrot.slane %v3076_v48, 1  ;;  %v360_v2 = vld [vmem:[%s2833_s21 + $0x118] sm:$0x1]  ;;  %3544 = vst [vmem:[#allocation7_spill] sm:$0xff] %v3114_v12  ;;  %v3137_v40 = vld [vmem:[%s2833_s21 + $0x140] sm:$0xff] }
  0x2d   : > { %v481_v60 = vrot.slane %v3091_v53, 1  ;;  %v3096_v63 = vsel %vm424_vm2, %v475_v43, %v476_v44  ;;  %v483_v13 = vrot.slane %v360_v2, 1  ;;  %v485_v15 = vrot.slane %v3099_v1, 1  ;;  %v3122_v27 = vld [vmem:[%s2833_s21 + $0x138] sm:$0xff]  ;;  %v363_v28 = vld [vmem:[%s2833_s21 + $0x130] sm:$0x1] }
  0x2e   : > { %v3109_v8 = vsel %vm424_vm2, %v476_v44, %v478_v54  ;;  %v486_v19 = vrot.slane %v3114_v12, 1  ;;  %3545 = vst [vmem:[#allocation8_spill] sm:$0xff] %v3122_v27  ;;  %3546 = vst [vmem:[#allocation9_spill] sm:$0xff] %v3137_v40  ;;  %v488_v43 = vrot.slane %v363_v28, 1  ;;  %v490_v44 = vrot.slane %v3122_v27, 1  ;;  %s1867_s12 = sshll.u32 %s281_s11, 4  ;;  %s3483_s12 = int_to_ptr.vmem [resolvable:$true] %s1867_s12 }
  0x2f   : > { %2302 = vmatmul.mubr.msk.f32.gmra.mrb[6].mxu1 %vm516_vm1, %v2933_v41  ;;  %2405 = vmatmul.mubr.msk.f32.gmra.mrb[8].mxu0 %vm516_vm1, %v2938_v42  ;;  %v3119_v23 = vsel %vm424_vm2, %v480_v57, %v481_v60  ;;  %v3132_v35 = vsel %vm424_vm2, %v481_v60, %v483_v13  ;;  %v491_v49 = vrot.slane %v3137_v40, 1  ;;  %v3145_v57 = vld [vmem:[%s2833_s21 + $0x150] sm:$0xff]  ;;  %v366_v2 = vld [vmem:[%s2833_s21 + $0x148] sm:$0x1]  ;;  %v3160_v13 = vld [vmem:[%s2833_s21 + $0x158] sm:$0xff]  ;;  %s1850_s22 = scalar_lea.sflag [#allocation3], %s279_s8 }
  0x30   : > { %2304 = vmatprep.mubr.msk.f32.mxu1 %vm516_vm1, %v2943_v46  ;;  %2407 = vmatprep.mubr.msk.f32.mxu0 %vm516_vm1, %v2946_v47  ;;  %v3142_v54 = vsel %vm424_vm2, %v485_v15, %v486_v19  ;;  %3547 = vst [vmem:[#allocation10_spill] sm:$0xff] %v3145_v57  ;;  %v3155_v60 = vsel %vm424_vm2, %v486_v19, %v488_v43  ;;  %3548 = vst [vmem:[#allocation11_spill] sm:$0xff] %v3160_v13  ;;  %v493_v15 = vrot.slane %v366_v2, 1  ;;  %v3183_v43 = vld [vmem:[%s2833_s21 + $0x170] sm:$0xff]  ;;  %s2644_s24 = scalar_lea.vmem %s3483_s12, 32  ;;  %s2724_s18 = smov [#allocation2]  }
  0x31   : > { %v495_v28 = vrot.slane %v3145_v57, 1  ;;  %v496_v59 = vrot.slane %v3160_v13, 1  ;;  %v3165_v0 = vsel %vm424_vm2, %v490_v44, %v491_v49  ;;  %p2645_p12 = scmp.ne.s32.totalorder %s3483_s12, %s2644_s24  ;;  %s2648_s26 = sshll.u32 %s2724_s18, 4  ;;  %s2649_s26 = int_to_ptr.vmem [resolvable:$false] %s2648_s26 }
  0x32   : > { %v3178_v19 = vsel %vm424_vm2, %v491_v49, %v493_v15  ;;  %p2651_p1 = scmp.lt.s32.totalorder %s3483_s12, %s2649_s26 }
  0x33   : > { %2305 = vmatmul.mubr.msk.f32.gmra.mrb[8].mxu1 %vm516_vm1, %v2962_v50  ;;  %2408 = vmatmul.mubr.msk.f32.gmra.mrb[10].mxu0 %vm516_vm1, %v2967_v51  ;;  %p2646_p13 = pnand %p2645_p12, %p2790_p4 }
  0x34   : > { %2307 = vmatprep.mubr.msk.f32.mxu1 %vm516_vm1, %v2972_v55  ;;  %2410 = vmatprep.mubr.msk.f32.mxu0 %vm516_vm1, %v2975_v56 }
  0x35   : > { %p2647_p0 = pneg %p2646_p13 }
  0x37   : > { %2308 = vmatmul.mubr.msk.f32.gmra.mrb[10].mxu1 %vm516_vm1, %v2989_v61  ;;  %2411 = vmatmul.mubr.msk.f32.gmra.mrb[12].mxu0 %vm516_vm1, %v2994_v62 }
  0x38   : > { %2310 = vmatprep.mubr.msk.f32.mxu1 %vm516_vm1, %v3004_v3  ;;  %2413 = vmatprep.mubr.msk.f32.mxu0 %vm516_vm1, %v3007_v7 }
  0x3b   : > { %2311 = vmatmul.mubr.msk.f32.gmra.mrb[12].mxu1 %vm516_vm1, %v3017_v10  ;;  %2414 = vmatmul.mubr.msk.f32.gmra.mrb[14].mxu0 %vm516_vm1, %v3022_v11 }
  0x3c   : > { %2313 = vmatprep.mubr.msk.f32.mxu1 %vm516_vm1, %v3027_v16  ;;  %2416 = vmatprep.mubr.msk.f32.mxu0 %vm516_vm1, %v3030_v18 }
  0x3f   : > { %2314 = vmatmul.mubr.msk.f32.gmra.mrb[14].mxu1 %vm516_vm1, %v3040_v20  ;;  %2417 = vmatmul.mubr.msk.f32.gmra.mrb[16].mxu0 %vm516_vm1, %v3045_v21 }
  0x40   : > { %2316 = vmatprep.mubr.msk.f32.mxu1 %vm516_vm1, %v3050_v29  ;;  %2419 = vmatprep.mubr.msk.f32.mxu0 %vm516_vm1, %v3053_v32 }
  0x43   : > { %2317 = vmatmul.mubr.msk.f32.gmra.mrb[16].mxu1 %vm516_vm1, %v3063_v36  ;;  %2420 = vmatmul.mubr.msk.f32.gmra.mrb[18].mxu0 %vm516_vm1, %v3068_v37 }
  0x44   : > { %2319 = vmatprep.mubr.msk.f32.mxu1 %vm516_vm1, %v3073_v45  ;;  %2422 = vmatprep.mubr.msk.f32.mxu0 %vm516_vm1, %v3076_v48 }
  0x47   : > { %2320 = vmatmul.mubr.msk.f32.gmra.mrb[18].mxu1 %vm516_vm1, %v3086_v52  ;;  %2423 = vmatmul.mubr.msk.f32.gmra.mrb[20].mxu0 %vm516_vm1, %v3091_v53 }
  0x48   : > { %2322 = vmatprep.mubr.msk.f32.mxu1 %vm516_vm1, %v3096_v63  ;;  %2425 = vmatprep.mubr.msk.f32.mxu0 %vm516_vm1, %v3099_v1  ;;  %v372_v1 = vld [vmem:[%s2833_s21 + $0x178] sm:$0x1] }
  0x49   : > { %v503_v49 = vrot.slane %v372_v1, 1 }
  0x4b   : > { %2323 = vmatmul.mubr.msk.f32.gmra.mrb[20].mxu1 %vm516_vm1, %v3109_v8  ;;  %2426 = vmatmul.mubr.msk.f32.gmra.mrb[22].mxu0 %vm516_vm1, %v3114_v12  ;;  %v3188_v12 = vsel %vm424_vm2, %v495_v28, %v496_v59 }
  0x4c   : > { %2325 = vmatprep.mubr.msk.f32.mxu1 %vm516_vm1, %v3119_v23  ;;  %2428 = vmatprep.mubr.msk.f32.mxu0 %vm516_vm1, %v3122_v27  ;;  %v369_v27 = vld [vmem:[%s2833_s21 + $0x160] sm:$0x1] }
  0x4d   : > { %v498_v44 = vrot.slane %v369_v27, 1 }
  0x4f   : > { %2326 = vmatmul.mubr.msk.f32.gmra.mrb[22].mxu1 %vm516_vm1, %v3132_v35  ;;  %2429 = vmatmul.mubr.msk.f32.gmra.mrb[24].mxu0 %vm516_vm1, %v3137_v40  ;;  %v3168_v40 = vld [vmem:[%s2833_s21 + $0x168] sm:$0xff]  ;;  %v3201_v27 = vsel %vm424_vm2, %v496_v59, %v498_v44  ;;  %s3481_s21 = scalar_lea.hbm %s3532_s4, %s2152_s10 }
  0x50   : > { %2328 = vmatprep.mubr.msk.f32.mxu1 %vm516_vm1, %v3142_v54  ;;  %2431 = vmatprep.mubr.msk.f32.mxu0 %vm516_vm1, %v3145_v57  ;;  %v500_v2 = vrot.slane %v3168_v40, 1  ;;  %v501_v57 = vrot.slane %v3183_v43, 1 }
  0x52   : > { %v502_v15 = vsel %vm424_vm2, %v500_v2, %v501_v57  ;;  %v504_v28 = vsel %vm424_vm2, %v501_v57, %v503_v49 }
  0x53   : > { %2329 = vmatmul.mubr.msk.f32.gmra.mrb[24].mxu1 %vm516_vm1, %v3155_v60  ;;  %2432 = vmatmul.mubr.msk.f32.gmra.mrb[26].mxu0 %vm516_vm1, %v3160_v13  ;;  %v3191_v13 = vld [vmem:[%s2952_s29] sm:$0xff]  ;;  %s2650_s29 = scalar_lea.vmem %s2649_s26, 64 }
  0x54   : > { %2331 = vmatprep.mubr.msk.f32.mxu1 %vm516_vm1, %v3165_v0  ;;  %2434 = vmatprep.mubr.msk.f32.mxu0 %vm516_vm1, %v3168_v40  ;;  %p2652_p2 = scmp.lt.s32.totalorder %s2650_s29, %s2644_s24 }
  0x56   : > { %p2653_p3 = por %p2652_p2, %p2651_p1 }
  0x57   : > { %2332 = vmatmul.mubr.msk.f32.gmra.mrb[26].mxu1 %vm516_vm1, %v3178_v19  ;;  %2435 = vmatmul.mubr.msk.f32.gmra.mrb[28].mxu0 %vm516_vm1, %v3183_v43 }
  0x58   : > { %2334 = vmatprep.mubr.msk.f32.mxu1 %vm516_vm1, %v3188_v12  ;;  %2437 = vmatprep.mubr.msk.f32.mxu0 %vm516_vm1, %v3191_v13  ;;  %p2654_p5 = pnand %p2653_p3, %p2647_p0 }
  0x5b   : > { %2335 = vmatmul.mubr.msk.f32.gmra.mrb[28].mxu1 %vm516_vm1, %v3201_v27  ;;  %2438 = vmatmul.mubr.msk.f32.gmra.mrb[30].mxu0 %vm516_vm1, %v2979_v58 }
  0x5c   : > { %2337 = vmatprep.mubr.msk.f32.mxu1 %vm516_vm1, %v502_v15  ;;  %2442 = vmatprep.mubr.msk.f32.mxu0 %vm516_vm1, %v2871_v22  ;;  %v3553_v22 = vld [vmem:[#allocation9_spill] sm:$0xff] }
  0x5f   : > { %2338 = vmatmul.mubr.msk.f32.gmra.mrb[30].mxu1 %vm516_vm1, %v504_v28  ;;  %2443 = vmatmul.mubr.msk.f32.vlgmr.msra.gmra.mrb[0].mxu0 %vm516_vm1, %v2885_v25  ;;  %v3555_v25 = vld [vmem:[#allocation11_spill] sm:$0xff] }
  0x60   : > { %2342 = vmatprep.mubr.msk.f32.mxu1 %vm516_vm1, %v2842_v6  ;;  %2445 = vmatprep.mubr.msk.f32.mxu0 %vm516_vm1, %v2895_v30  ;;  %v3550_v6 = vld [vmem:[#allocation7_spill] sm:$0xff] }
  0x63   : > { %2343 = vmatmul.mubr.msk.f32.vlgmr.msra.gmra.mrb[0].mxu1 %vm516_vm1, %v2849_v9  ;;  %2446 = vmatmul.mubr.msk.f32.gmra.mrb[2].mxu0 %vm516_vm1, %v2908_v33  ;;  %v3551_v9 = vld [vmem:[#allocation8_spill] sm:$0xff] }
  0x64   : > { %2345 = vmatprep.mubr.msk.f32.mxu1 %vm516_vm1, %v2836_v4  ;;  %2448 = vmatprep.mubr.msk.f32.mxu0 %vm516_vm1, %v2918_v38  ;;  %v3549_v4 = vld [vmem:[#allocation6_spill] sm:$0xff] }
  0x67   : > { %2346 = vmatmul.mubr.msk.f32.gmra.mrb[2].mxu1 %vm516_vm1, %v2839_v5  ;;  %2449 = vmatmul.mubr.msk.f32.gmra.mrb[4].mxu0 %vm516_vm1, %v2933_v41  ;;  %v508_v5 = vrot.slane %v3191_v13, 1 }
  0x68   : > { %2348 = vmatprep.mubr.msk.f32.mxu1 %vm516_vm1, %v2857_v14  ;;  %2451 = vmatprep.mubr.msk.f32.mxu0 %vm516_vm1, %v2943_v46  ;;  %v3552_v14 = vrot.slane %v2979_v58, 1 }
  0x6b   : > { %2349 = vmatmul.mubr.msk.f32.gmra.mrb[4].mxu1 %vm516_vm1, %v2865_v17  ;;  %2452 = vmatmul.mubr.msk.f32.gmra.mrb[6].mxu0 %vm516_vm1, %v2962_v50  ;;  %v510_v17 = vsel %vm424_vm2, %v508_v5, %v3552_v14 }
  0x6c   : > { %2351 = vmatprep.mubr.msk.f32.mxu1 %vm516_vm1, %v2876_v24  ;;  %2454 = vmatprep.mubr.msk.f32.mxu0 %vm516_vm1, %v2972_v55  ;;  %v3554_v24 = vld [vmem:[#allocation10_spill] sm:$0xff] }
  0x6f   : > { %2352 = vmatmul.mubr.msk.f32.gmra.mrb[6].mxu1 %vm516_vm1, %v2888_v26  ;;  %2455 = vmatmul.mubr.msk.f32.gmra.mrb[8].mxu0 %vm516_vm1, %v2989_v61  ;;  %v3556_v26 = vld [vmem:[#allocation5_spill] sm:$0xff] }
  0x70   : > { %2354 = vmatprep.mubr.msk.f32.mxu1 %vm516_vm1, %v2898_v31  ;;  %2457 = vmatprep.mubr.msk.f32.mxu0 %vm516_vm1, %v3004_v3 }
  0x73   : > { %2355 = vmatmul.mubr.msk.f32.gmra.mrb[8].mxu1 %vm516_vm1, %v2913_v34  ;;  %2458 = vmatmul.mubr.msk.f32.gmra.mrb[10].mxu0 %vm516_vm1, %v3017_v10 }
  0x74   : > { %2357 = vmatprep.mubr.msk.f32.mxu1 %vm516_vm1, %v2921_v39  ;;  %2460 = vmatprep.mubr.msk.f32.mxu0 %vm516_vm1, %v3027_v16 }
  0x77   : > { %2358 = vmatmul.mubr.msk.f32.gmra.mrb[10].mxu1 %vm516_vm1, %v2938_v42  ;;  %2461 = vmatmul.mubr.msk.f32.gmra.mrb[12].mxu0 %vm516_vm1, %v3040_v20 }
  0x78   : > { %2360 = vmatprep.mubr.msk.f32.mxu1 %vm516_vm1, %v2946_v47  ;;  %2463 = vmatprep.mubr.msk.f32.mxu0 %vm516_vm1, %v3050_v29 }
  0x7b   : > { %2361 = vmatmul.mubr.msk.f32.gmra.mrb[12].mxu1 %vm516_vm1, %v2967_v51  ;;  %2464 = vmatmul.mubr.msk.f32.gmra.mrb[14].mxu0 %vm516_vm1, %v3063_v36 }
  0x7c   : > { %2363 = vmatprep.mubr.msk.f32.mxu1 %vm516_vm1, %v2975_v56  ;;  %2466 = vmatprep.mubr.msk.f32.mxu0 %vm516_vm1, %v3073_v45 }
  0x7f   : > { %2364 = vmatmul.mubr.msk.f32.gmra.mrb[14].mxu1 %vm516_vm1, %v2994_v62  ;;  %2467 = vmatmul.mubr.msk.f32.gmra.mrb[16].mxu0 %vm516_vm1, %v3086_v52 }
  0x80   : > { %2366 = vmatprep.mubr.msk.f32.mxu1 %vm516_vm1, %v3007_v7  ;;  %2469 = vmatprep.mubr.msk.f32.mxu0 %vm516_vm1, %v3096_v63 }
  0x83   : > { %2367 = vmatmul.mubr.msk.f32.gmra.mrb[16].mxu1 %vm516_vm1, %v3022_v11  ;;  %2470 = vmatmul.mubr.msk.f32.gmra.mrb[18].mxu0 %vm516_vm1, %v3109_v8 }
  0x84   : > { %2369 = vmatprep.mubr.msk.f32.mxu1 %vm516_vm1, %v3030_v18  ;;  %2472 = vmatprep.mubr.msk.f32.mxu0 %vm516_vm1, %v3119_v23 }
  0x87   : > { %2370 = vmatmul.mubr.msk.f32.gmra.mrb[18].mxu1 %vm516_vm1, %v3045_v21  ;;  %2473 = vmatmul.mubr.msk.f32.gmra.mrb[20].mxu0 %vm516_vm1, %v3132_v35 }
  0x88   : > { %2372 = vmatprep.mubr.msk.f32.mxu1 %vm516_vm1, %v3053_v32  ;;  %2475 = vmatprep.mubr.msk.f32.mxu0 %vm516_vm1, %v3142_v54 }
  0x8b   : > { %2373 = vmatmul.mubr.msk.f32.gmra.mrb[20].mxu1 %vm516_vm1, %v3068_v37  ;;  %2476 = vmatmul.mubr.msk.f32.gmra.mrb[22].mxu0 %vm516_vm1, %v3155_v60 }
  0x8c   : > { %2375 = vmatprep.mubr.msk.f32.mxu1 %vm516_vm1, %v3076_v48  ;;  %2478 = vmatprep.mubr.msk.f32.mxu0 %vm516_vm1, %v3165_v0 }
  0x8f   : > { %2376 = vmatmul.mubr.msk.f32.gmra.mrb[22].mxu1 %vm516_vm1, %v3091_v53  ;;  %2479 = vmatmul.mubr.msk.f32.gmra.mrb[24].mxu0 %vm516_vm1, %v3178_v19 }
  0x90   : > { %2378 = vmatprep.mubr.msk.f32.mxu1 %vm516_vm1, %v3549_v4  ;;  %2481 = vmatprep.mubr.msk.f32.mxu0 %vm516_vm1, %v3188_v12 }
  0x93   : > { %2379 = vmatmul.mubr.msk.f32.gmra.mrb[24].mxu1 %vm516_vm1, %v3550_v6  ;;  %2482 = vmatmul.mubr.msk.f32.gmra.mrb[26].mxu0 %vm516_vm1, %v3201_v27 }
  0x94   : > { %2381 = vmatprep.mubr.msk.f32.mxu1 %vm516_vm1, %v3551_v9  ;;  %2484 = vmatprep.mubr.msk.f32.mxu0 %vm516_vm1, %v502_v15 }
  0x97   : > { %2382 = vmatmul.mubr.msk.f32.gmra.mrb[26].mxu1 %vm516_vm1, %v3553_v22  ;;  %2485 = vmatmul.mubr.msk.f32.gmra.mrb[28].mxu0 %vm516_vm1, %v504_v28 }
  0x98   : > { %2384 = vmatprep.mubr.msk.f32.mxu1 %vm516_vm1, %v3554_v24  ;;  %2487 = vmatprep.mubr.msk.f32.mxu0 %vm516_vm1, %v510_v17 }
  0x9b   : > { %2385 = vmatmul.mubr.msk.f32.gmra.mrb[28].mxu1 %vm516_vm1, %v3555_v25  ;;  %2488 = vmatmul.mubr.msk.f32.gmra.mrb[30].mxu0 %vm516_vm1, %v3556_v26 }
  0x9c   : > { %2387 = vmatprep.mubr.msk.f32.mxu1 %vm516_vm1, %v3168_v40 }
  0x9f   : > { %2388 = vmatmul.mubr.msk.f32.gmra.mrb[30].mxu1 %vm516_vm1, %v3183_v43 }
 0x132   : > { %v2444_v30 = vpop.f32.mrb[0].mxu0 }
 0x133   : > { %v1443_v31 = vpop.f32.mrb[1].mxu0 }
 0x136   : > { %v2344_v33 = vpop.f32.mrb[0].mxu1  ;;  %v2447_v34 = vpop.f32.mrb[2].mxu0 }
 0x137   : > { %v2490_v38 = vadd.f32 %v2444_v30, %v2344_v33  ;;  %v943_v39 = vpop.f32.mrb[1].mxu1  ;;  %v1453_v41 = vpop.f32.mrb[3].mxu0 }
 0x138   : > { %v2491_v42 = vadd.f32 %v1443_v31, %v943_v39 }
 0x139   : > { %1636 = vst.msk [vmem:[%s3346_s7 + $0x8] sm:$0xff] %vm1634_vm3, %v2490_v38  ;;  %v1668_v46 = vsel %vm1634_vm3, %v2490_v38, 0.0  ;;  %v1739_v47 = vmul.f32 %v2490_v38, %v2490_v38 }
 0x13a   : > { %1635 = vst.msk [vmem:[%s3346_s7] sm:$0xff] %vm1634_vm3, %v2491_v42  ;;  %v1667_v50 = vsel %vm1634_vm3, %v2491_v42, 0.0  ;;  %v1738_v51 = vmul.f32 %v2491_v42, %v2491_v42  ;;  %v2347_v55 = vpop.f32.mrb[2].mxu1  ;;  %v2450_v56 = vpop.f32.mrb[4].mxu0 }
 0x13b   : > { %v1771_v58 = vsel %vm1634_vm3, %v1739_v47, 0.0  ;;  %v1669_v59 = vadd.f32 %v1668_v46, %v1667_v50  ;;  %v2492_v61 = vadd.f32 %v2447_v34, %v2347_v55  ;;  %v953_v62 = vpop.f32.mrb[3].mxu1  ;;  %v1463_v0 = vpop.f32.mrb[5].mxu0 }
 0x13c   : > { %v1770_v3 = vsel %vm1634_vm3, %v1738_v51, 0.0  ;;  %v2493_v7 = vadd.f32 %v1453_v41, %v953_v62 }
 0x13d   : > { %v1772_v10 = vadd.f32 %v1771_v58, %v1770_v3  ;;  %1638 = vst.msk [vmem:[%s3346_s7 + $0x18] sm:$0xff] %vm1634_vm3, %v2492_v61  ;;  %v1741_v11 = vmul.f32 %v2492_v61, %v2492_v61  ;;  %v1672_v45 = vsel %vm1634_vm3, %v2492_v61, 0.0 }
 0x13e   : > { %1637 = vst.msk [vmem:[%s3346_s7 + $0x10] sm:$0xff] %vm1634_vm3, %v2493_v7  ;;  %v1670_v16 = vsel %vm1634_vm3, %v2493_v7, 0.0  ;;  %v1740_v18 = vmul.f32 %v2493_v7, %v2493_v7  ;;  %v2350_v20 = vpop.f32.mrb[4].mxu1  ;;  %v2453_v21 = vpop.f32.mrb[6].mxu0 }
 0x13f   : > { %v1671_v29 = vadd.f32 %v1670_v16, %v1669_v59  ;;  %v2494_v32 = vadd.f32 %v2450_v56, %v2350_v20  ;;  %v963_v36 = vpop.f32.mrb[5].mxu1  ;;  %v1473_v37 = vpop.f32.mrb[7].mxu0  ;;  %v1775_v1 = vsel %vm1634_vm3, %v1741_v11, 0.0 }
 0x140   : > { %v1773_v48 = vsel %vm1634_vm3, %v1740_v18, 0.0  ;;  %v2495_v52 = vadd.f32 %v1463_v0, %v963_v36 }
 0x141   : > { %v1774_v53 = vadd.f32 %v1773_v48, %v1772_v10  ;;  %1640 = vst.msk [vmem:[%s3346_s7 + $0x28] sm:$0xff] %vm1634_vm3, %v2494_v32  ;;  %v1673_v63 = vadd.f32 %v1672_v45, %v1671_v29  ;;  %v1743_v8 = vmul.f32 %v2494_v32, %v2494_v32  ;;  %v1676_v43 = vsel %vm1634_vm3, %v2494_v32, 0.0 }
 0x142   : > { %1639 = vst.msk [vmem:[%s3346_s7 + $0x20] sm:$0xff] %vm1634_vm3, %v2495_v52  ;;  %v1674_v12 = vsel %vm1634_vm3, %v2495_v52, 0.0  ;;  %v1742_v23 = vmul.f32 %v2495_v52, %v2495_v52  ;;  %v2353_v35 = vpop.f32.mrb[6].mxu1  ;;  %v2456_v40 = vpop.f32.mrb[8].mxu0 }
 0x143   : > { %v1675_v54 = vadd.f32 %v1674_v12, %v1673_v63  ;;  %v1776_v57 = vadd.f32 %v1775_v1, %v1774_v53  ;;  %v2496_v60 = vadd.f32 %v2453_v21, %v2353_v35  ;;  %v973_v13 = vpop.f32.mrb[7].mxu1  ;;  %v1483_v19 = vpop.f32.mrb[9].mxu0  ;;  %v1779_v15 = vsel %vm1634_vm3, %v1743_v8, 0.0 }
 0x144   : > { %v1777_v44 = vsel %vm1634_vm3, %v1742_v23, 0.0  ;;  %v2497_v2 = vadd.f32 %v1473_v37, %v973_v13 }
 0x145   : > { %v1778_v27 = vadd.f32 %v1777_v44, %v1776_v57  ;;  %1642 = vst.msk [vmem:[%s3346_s7 + $0x38] sm:$0xff] %vm1634_vm3, %v2496_v60  ;;  %v1677_v49 = vadd.f32 %v1676_v43, %v1675_v54  ;;  %v1745_v28 = vmul.f32 %v2496_v60, %v2496_v60  ;;  %v1680_v26 = vsel %vm1634_vm3, %v2496_v60, 0.0 }
 0x146   : > { %1641 = vst.msk [vmem:[%s3346_s7 + $0x30] sm:$0xff] %vm1634_vm3, %v2497_v2  ;;  %v1678_v4 = vsel %vm1634_vm3, %v2497_v2, 0.0  ;;  %v1744_v5 = vmul.f32 %v2497_v2, %v2497_v2  ;;  %v2356_v6 = vpop.f32.mrb[8].mxu1  ;;  %v2459_v9 = vpop.f32.mrb[10].mxu0 }
 0x147   : > { %v1679_v14 = vadd.f32 %v1678_v4, %v1677_v49  ;;  %v1780_v17 = vadd.f32 %v1779_v15, %v1778_v27  ;;  %v2498_v22 = vadd.f32 %v2456_v40, %v2356_v6  ;;  %v983_v24 = vpop.f32.mrb[9].mxu1  ;;  %v1493_v25 = vpop.f32.mrb[11].mxu0  ;;  %v1783_v38 = vsel %vm1634_vm3, %v1745_v28, 0.0 }
 0x148   : > { %v1781_v30 = vsel %vm1634_vm3, %v1744_v5, 0.0  ;;  %v2499_v31 = vadd.f32 %v1483_v19, %v983_v24 }
 0x149   : > { %v1782_v33 = vadd.f32 %v1781_v30, %v1780_v17  ;;  %1644 = vst.msk [vmem:[%s3346_s7 + $0x48] sm:$0xff] %vm1634_vm3, %v2498_v22  ;;  %v1681_v34 = vadd.f32 %v1680_v26, %v1679_v14  ;;  %v1747_v39 = vmul.f32 %v2498_v22, %v2498_v22  ;;  %v1684_v59 = vsel %vm1634_vm3, %v2498_v22, 0.0 }
 0x14a   : > { %1643 = vst.msk [vmem:[%s3346_s7 + $0x40] sm:$0xff] %vm1634_vm3, %v2499_v31  ;;  %v1682_v41 = vsel %vm1634_vm3, %v2499_v31, 0.0  ;;  %v1746_v42 = vmul.f32 %v2499_v31, %v2499_v31  ;;  %v2359_v46 = vpop.f32.mrb[10].mxu1  ;;  %v2462_v47 = vpop.f32.mrb[12].mxu0 }
 0x14b   : > { %v1683_v50 = vadd.f32 %v1682_v41, %v1681_v34  ;;  %v1784_v51 = vadd.f32 %v1783_v38, %v1782_v33  ;;  %v2500_v55 = vadd.f32 %v2459_v9, %v2359_v46  ;;  %v993_v56 = vpop.f32.mrb[11].mxu1  ;;  %v1503_v58 = vpop.f32.mrb[13].mxu0  ;;  %v1787_v7 = vsel %vm1634_vm3, %v1747_v39, 0.0 }
 0x14c   : > { %v1785_v61 = vsel %vm1634_vm3, %v1746_v42, 0.0  ;;  %v2501_v62 = vadd.f32 %v1493_v25, %v993_v56 }
 0x14d   : > { %v1786_v0 = vadd.f32 %v1785_v61, %v1784_v51  ;;  %1646 = vst.msk [vmem:[%s3346_s7 + $0x58] sm:$0xff] %vm1634_vm3, %v2500_v55  ;;  %v1685_v3 = vadd.f32 %v1684_v59, %v1683_v50  ;;  %v1749_v10 = vmul.f32 %v2500_v55, %v2500_v55  ;;  %v1688_v45 = vsel %vm1634_vm3, %v2500_v55, 0.0 }
 0x14e   : > { %1645 = vst.msk [vmem:[%s3346_s7 + $0x50] sm:$0xff] %vm1634_vm3, %v2501_v62  ;;  %v1686_v11 = vsel %vm1634_vm3, %v2501_v62, 0.0  ;;  %v1748_v16 = vmul.f32 %v2501_v62, %v2501_v62  ;;  %v2362_v18 = vpop.f32.mrb[12].mxu1  ;;  %v2465_v20 = vpop.f32.mrb[14].mxu0 }
 0x14f   : > { %v1687_v21 = vadd.f32 %v1686_v11, %v1685_v3  ;;  %v1788_v29 = vadd.f32 %v1787_v7, %v1786_v0  ;;  %v2502_v32 = vadd.f32 %v2462_v47, %v2362_v18  ;;  %v1003_v36 = vpop.f32.mrb[13].mxu1  ;;  %v1513_v37 = vpop.f32.mrb[15].mxu0  ;;  %v1791_v1 = vsel %vm1634_vm3, %v1749_v10, 0.0 }
 0x150   : > { %v1789_v48 = vsel %vm1634_vm3, %v1748_v16, 0.0  ;;  %v2503_v52 = vadd.f32 %v1503_v58, %v1003_v36 }
 0x151   : > { %v1790_v53 = vadd.f32 %v1789_v48, %v1788_v29  ;;  %1648 = vst.msk [vmem:[%s3346_s7 + $0x68] sm:$0xff] %vm1634_vm3, %v2502_v32  ;;  %v1689_v63 = vadd.f32 %v1688_v45, %v1687_v21  ;;  %v1751_v8 = vmul.f32 %v2502_v32, %v2502_v32  ;;  %v1692_v43 = vsel %vm1634_vm3, %v2502_v32, 0.0 }
 0x152   : > { %1647 = vst.msk [vmem:[%s3346_s7 + $0x60] sm:$0xff] %vm1634_vm3, %v2503_v52  ;;  %v1690_v12 = vsel %vm1634_vm3, %v2503_v52, 0.0  ;;  %v1750_v23 = vmul.f32 %v2503_v52, %v2503_v52  ;;  %v2365_v35 = vpop.f32.mrb[14].mxu1  ;;  %v2468_v40 = vpop.f32.mrb[16].mxu0 }
 0x153   : > { %v1691_v54 = vadd.f32 %v1690_v12, %v1689_v63  ;;  %v1792_v57 = vadd.f32 %v1791_v1, %v1790_v53  ;;  %v2504_v60 = vadd.f32 %v2465_v20, %v2365_v35  ;;  %v1013_v13 = vpop.f32.mrb[15].mxu1  ;;  %v1523_v19 = vpop.f32.mrb[17].mxu0  ;;  %v1795_v15 = vsel %vm1634_vm3, %v1751_v8, 0.0 }
 0x154   : > { %v1793_v44 = vsel %vm1634_vm3, %v1750_v23, 0.0  ;;  %v2505_v2 = vadd.f32 %v1513_v37, %v1013_v13 }
 0x155   : > { %v1794_v27 = vadd.f32 %v1793_v44, %v1792_v57  ;;  %1650 = vst.msk [vmem:[%s3346_s7 + $0x78] sm:$0xff] %vm1634_vm3, %v2504_v60  ;;  %v1693_v49 = vadd.f32 %v1692_v43, %v1691_v54  ;;  %v1753_v28 = vmul.f32 %v2504_v60, %v2504_v60  ;;  %v1696_v26 = vsel %vm1634_vm3, %v2504_v60, 0.0 }
 0x156   : > { %1649 = vst.msk [vmem:[%s3346_s7 + $0x70] sm:$0xff] %vm1634_vm3, %v2505_v2  ;;  %v1694_v4 = vsel %vm1634_vm3, %v2505_v2, 0.0  ;;  %v1752_v5 = vmul.f32 %v2505_v2, %v2505_v2  ;;  %v2368_v6 = vpop.f32.mrb[16].mxu1  ;;  %v2471_v9 = vpop.f32.mrb[18].mxu0 }
 0x157   : > { %v1695_v14 = vadd.f32 %v1694_v4, %v1693_v49  ;;  %v1796_v17 = vadd.f32 %v1795_v15, %v1794_v27  ;;  %v2506_v22 = vadd.f32 %v2468_v40, %v2368_v6  ;;  %v1023_v24 = vpop.f32.mrb[17].mxu1  ;;  %v1533_v25 = vpop.f32.mrb[19].mxu0  ;;  %v1799_v38 = vsel %vm1634_vm3, %v1753_v28, 0.0 }
 0x158   : > { %v1797_v30 = vsel %vm1634_vm3, %v1752_v5, 0.0  ;;  %v2507_v31 = vadd.f32 %v1523_v19, %v1023_v24 }
 0x159   : > { %v1798_v33 = vadd.f32 %v1797_v30, %v1796_v17  ;;  %1652 = vst.msk [vmem:[%s3346_s7 + $0x88] sm:$0xff] %vm1634_vm3, %v2506_v22  ;;  %v1697_v34 = vadd.f32 %v1696_v26, %v1695_v14  ;;  %v1755_v39 = vmul.f32 %v2506_v22, %v2506_v22  ;;  %v1700_v59 = vsel %vm1634_vm3, %v2506_v22, 0.0 }
 0x15a   : > { %1651 = vst.msk [vmem:[%s3346_s7 + $0x80] sm:$0xff] %vm1634_vm3, %v2507_v31  ;;  %v1698_v41 = vsel %vm1634_vm3, %v2507_v31, 0.0  ;;  %v1754_v42 = vmul.f32 %v2507_v31, %v2507_v31  ;;  %v2371_v46 = vpop.f32.mrb[18].mxu1  ;;  %v2474_v47 = vpop.f32.mrb[20].mxu0 }
 0x15b   : > { %v1699_v50 = vadd.f32 %v1698_v41, %v1697_v34  ;;  %v1800_v51 = vadd.f32 %v1799_v38, %v1798_v33  ;;  %v2508_v55 = vadd.f32 %v2471_v9, %v2371_v46  ;;  %v1033_v56 = vpop.f32.mrb[19].mxu1  ;;  %v1543_v58 = vpop.f32.mrb[21].mxu0  ;;  %v1803_v7 = vsel %vm1634_vm3, %v1755_v39, 0.0 }
 0x15c   : > { %v1801_v61 = vsel %vm1634_vm3, %v1754_v42, 0.0  ;;  %v2509_v62 = vadd.f32 %v1533_v25, %v1033_v56 }
 0x15d   : > { %v1802_v0 = vadd.f32 %v1801_v61, %v1800_v51  ;;  %1654 = vst.msk [vmem:[%s3346_s7 + $0x98] sm:$0xff] %vm1634_vm3, %v2508_v55  ;;  %v1701_v3 = vadd.f32 %v1700_v59, %v1699_v50  ;;  %v1757_v10 = vmul.f32 %v2508_v55, %v2508_v55  ;;  %v1704_v45 = vsel %vm1634_vm3, %v2508_v55, 0.0 }
 0x15e   : > { %1653 = vst.msk [vmem:[%s3346_s7 + $0x90] sm:$0xff] %vm1634_vm3, %v2509_v62  ;;  %v1702_v11 = vsel %vm1634_vm3, %v2509_v62, 0.0  ;;  %v1756_v16 = vmul.f32 %v2509_v62, %v2509_v62  ;;  %v2374_v18 = vpop.f32.mrb[20].mxu1  ;;  %v2477_v20 = vpop.f32.mrb[22].mxu0 }
 0x15f   : > { %v1703_v21 = vadd.f32 %v1702_v11, %v1701_v3  ;;  %v1804_v29 = vadd.f32 %v1803_v7, %v1802_v0  ;;  %v2510_v32 = vadd.f32 %v2474_v47, %v2374_v18  ;;  %v1043_v36 = vpop.f32.mrb[21].mxu1  ;;  %v1553_v37 = vpop.f32.mrb[23].mxu0  ;;  %v1807_v1 = vsel %vm1634_vm3, %v1757_v10, 0.0 }
 0x160   : > { %v1805_v48 = vsel %vm1634_vm3, %v1756_v16, 0.0  ;;  %v2511_v52 = vadd.f32 %v1543_v58, %v1043_v36 }
 0x161   : > { %v1806_v53 = vadd.f32 %v1805_v48, %v1804_v29  ;;  %1656 = vst.msk [vmem:[%s3346_s7 + $0xa8] sm:$0xff] %vm1634_vm3, %v2510_v32  ;;  %v1705_v63 = vadd.f32 %v1704_v45, %v1703_v21  ;;  %v1759_v8 = vmul.f32 %v2510_v32, %v2510_v32  ;;  %v1708_v43 = vsel %vm1634_vm3, %v2510_v32, 0.0 }
 0x162   : > { %1655 = vst.msk [vmem:[%s3346_s7 + $0xa0] sm:$0xff] %vm1634_vm3, %v2511_v52  ;;  %v1706_v12 = vsel %vm1634_vm3, %v2511_v52, 0.0  ;;  %v1758_v23 = vmul.f32 %v2511_v52, %v2511_v52  ;;  %v2377_v35 = vpop.f32.mrb[22].mxu1  ;;  %v2480_v40 = vpop.f32.mrb[24].mxu0 }
 0x163   : > { %v1707_v54 = vadd.f32 %v1706_v12, %v1705_v63  ;;  %v1808_v57 = vadd.f32 %v1807_v1, %v1806_v53  ;;  %v2512_v60 = vadd.f32 %v2477_v20, %v2377_v35  ;;  %v1053_v13 = vpop.f32.mrb[23].mxu1  ;;  %v1563_v19 = vpop.f32.mrb[25].mxu0  ;;  %v1811_v15 = vsel %vm1634_vm3, %v1759_v8, 0.0 }
 0x164   : > { %v1809_v44 = vsel %vm1634_vm3, %v1758_v23, 0.0  ;;  %v2513_v2 = vadd.f32 %v1553_v37, %v1053_v13 }
 0x165   : > { %v1810_v27 = vadd.f32 %v1809_v44, %v1808_v57  ;;  %1658 = vst.msk [vmem:[%s3346_s7 + $0xb8] sm:$0xff] %vm1634_vm3, %v2512_v60  ;;  %v1709_v49 = vadd.f32 %v1708_v43, %v1707_v54  ;;  %v1761_v28 = vmul.f32 %v2512_v60, %v2512_v60  ;;  %v1712_v26 = vsel %vm1634_vm3, %v2512_v60, 0.0 }
 0x166   : > { %1657 = vst.msk [vmem:[%s3346_s7 + $0xb0] sm:$0xff] %vm1634_vm3, %v2513_v2  ;;  %v1710_v4 = vsel %vm1634_vm3, %v2513_v2, 0.0  ;;  %v1760_v5 = vmul.f32 %v2513_v2, %v2513_v2  ;;  %v2380_v6 = vpop.f32.mrb[24].mxu1  ;;  %v2483_v9 = vpop.f32.mrb[26].mxu0 }
 0x167   : > { %v1711_v14 = vadd.f32 %v1710_v4, %v1709_v49  ;;  %v1812_v17 = vadd.f32 %v1811_v15, %v1810_v27  ;;  %v2514_v22 = vadd.f32 %v2480_v40, %v2380_v6  ;;  %v1063_v24 = vpop.f32.mrb[25].mxu1  ;;  %v1573_v25 = vpop.f32.mrb[27].mxu0  ;;  %v1815_v38 = vsel %vm1634_vm3, %v1761_v28, 0.0 }
 0x168   : > { %v1813_v30 = vsel %vm1634_vm3, %v1760_v5, 0.0  ;;  %v2515_v31 = vadd.f32 %v1563_v19, %v1063_v24 }
 0x169   : > { %v1814_v33 = vadd.f32 %v1813_v30, %v1812_v17  ;;  %1660 = vst.msk [vmem:[%s3346_s7 + $0xc8] sm:$0xff] %vm1634_vm3, %v2514_v22  ;;  %v1713_v34 = vadd.f32 %v1712_v26, %v1711_v14  ;;  %v1763_v39 = vmul.f32 %v2514_v22, %v2514_v22  ;;  %v1716_v59 = vsel %vm1634_vm3, %v2514_v22, 0.0 }
 0x16a   : > { %1659 = vst.msk [vmem:[%s3346_s7 + $0xc0] sm:$0xff] %vm1634_vm3, %v2515_v31  ;;  %v1714_v41 = vsel %vm1634_vm3, %v2515_v31, 0.0  ;;  %v1762_v42 = vmul.f32 %v2515_v31, %v2515_v31  ;;  %v2383_v46 = vpop.f32.mrb[26].mxu1  ;;  %v2486_v47 = vpop.f32.mrb[28].mxu0 }
 0x16b   : > { %v1715_v50 = vadd.f32 %v1714_v41, %v1713_v34  ;;  %v1816_v51 = vadd.f32 %v1815_v38, %v1814_v33  ;;  %v2516_v55 = vadd.f32 %v2483_v9, %v2383_v46  ;;  %v1073_v56 = vpop.f32.mrb[27].mxu1  ;;  %v1583_v58 = vpop.f32.mrb[29].mxu0  ;;  %v1819_v7 = vsel %vm1634_vm3, %v1763_v39, 0.0 }
 0x16c   : > { %v1817_v61 = vsel %vm1634_vm3, %v1762_v42, 0.0  ;;  %v2517_v62 = vadd.f32 %v1573_v25, %v1073_v56 }
 0x16d   : > { %v1818_v0 = vadd.f32 %v1817_v61, %v1816_v51  ;;  %1662 = vst.msk [vmem:[%s3346_s7 + $0xd8] sm:$0xff] %vm1634_vm3, %v2516_v55  ;;  %v1717_v3 = vadd.f32 %v1716_v59, %v1715_v50  ;;  %v1765_v10 = vmul.f32 %v2516_v55, %v2516_v55  ;;  %v1720_v45 = vsel %vm1634_vm3, %v2516_v55, 0.0 }
 0x16e   : > { %1661 = vst.msk [vmem:[%s3346_s7 + $0xd0] sm:$0xff] %vm1634_vm3, %v2517_v62  ;;  %v1718_v11 = vsel %vm1634_vm3, %v2517_v62, 0.0  ;;  %v1764_v16 = vmul.f32 %v2517_v62, %v2517_v62  ;;  %v2386_v18 = vpop.f32.mrb[28].mxu1  ;;  %v2489_v20 = vpop.f32.mrb[30].mxu0 }
 0x16f   : > { %v1719_v21 = vadd.f32 %v1718_v11, %v1717_v3  ;;  %v1820_v29 = vadd.f32 %v1819_v7, %v1818_v0  ;;  %v2518_v32 = vadd.f32 %v2486_v47, %v2386_v18  ;;  %v1083_v36 = vpop.f32.mrb[29].mxu1  ;;  %v1593_v37 = vpop.f32.mrb[31].mxu0  ;;  %v1823_v1 = vsel %vm1634_vm3, %v1765_v10, 0.0 }
 0x170   : > { %v1821_v48 = vsel %vm1634_vm3, %v1764_v16, 0.0  ;;  %v2519_v52 = vadd.f32 %v1583_v58, %v1083_v36 }
 0x171   : > { %v1822_v53 = vadd.f32 %v1821_v48, %v1820_v29  ;;  %1664 = vst.msk [vmem:[%s3346_s7 + $0xe8] sm:$0xff] %vm1634_vm3, %v2518_v32  ;;  %v1721_v63 = vadd.f32 %v1720_v45, %v1719_v21  ;;  %v1767_v8 = vmul.f32 %v2518_v32, %v2518_v32  ;;  %v1724_v13 = vsel %vm1634_vm3, %v2518_v32, 0.0 }
 0x172   : > { %1663 = vst.msk [vmem:[%s3346_s7 + $0xe0] sm:$0xff] %vm1634_vm3, %v2519_v52  ;;  %v1722_v12 = vsel %vm1634_vm3, %v2519_v52, 0.0  ;;  %v1766_v23 = vmul.f32 %v2519_v52, %v2519_v52  ;;  %v2389_v35 = vpop.f32.mrb[30].mxu1 }
 0x173   : > { %v1723_v40 = vadd.f32 %v1722_v12, %v1721_v63  ;;  %v1824_v54 = vadd.f32 %v1823_v1, %v1822_v53  ;;  %v2520_v57 = vadd.f32 %v2489_v20, %v2389_v35  ;;  %v1093_v60 = vpop.f32.mrb[31].mxu1  ;;  %v1827_v49 = vsel %vm1634_vm3, %v1767_v8, 0.0 }
 0x174   : > { %v1825_v19 = vsel %vm1634_vm3, %v1766_v23, 0.0  ;;  %v2521_v43 = vadd.f32 %v1593_v37, %v1093_v60 }
 0x175   : > { %v1826_v44 = vadd.f32 %v1825_v19, %v1824_v54  ;;  %1666 = vst.msk [vmem:[%s3346_s7 + $0xf8] sm:$0xff] %vm1634_vm3, %v2520_v57  ;;  %v1769_v2 = vmul.f32 %v2520_v57, %v2520_v57  ;;  %v1725_v27 = vadd.f32 %v1724_v13, %v1723_v40  ;;  %v1728_v9 = vsel %vm1634_vm3, %v2520_v57, 0.0 }
 0x176   : > { %1665 = vst.msk [vmem:[%s3346_s7 + $0xf0] sm:$0xff] %vm1634_vm3, %v2521_v43  ;;  %v1726_v15 = vsel %vm1634_vm3, %v2521_v43, 0.0  ;;  %v1768_v28 = vmul.f32 %v2521_v43, %v2521_v43 }
 0x177   : > { %v1831_v4 = vsel %vm1634_vm3, %v1769_v2, 0.0  ;;  %v1727_v5 = vadd.f32 %v1726_v15, %v1725_v27  ;;  %v1828_v6 = vadd.f32 %v1827_v49, %v1826_v44 }
 0x178   : > { %v1829_v14 = vsel %vm1634_vm3, %v1768_v28, 0.0 }
 0x179   : > { %v1729_v17 = vadd.f32 %v1728_v9, %v1727_v5  ;;  %v1830_v22 = vadd.f32 %v1829_v14, %v1828_v6 }
 0x17b   : > { %v1730_v24 = vrot.slane %v1729_v17, 4  ;;  %v1832_v25 = vadd.f32 %v1831_v4, %v1830_v22 }
 0x17d   : > { %v1731_v26 = vadd.f32 %v1730_v24, %v1729_v17  ;;  %v1833_v30 = vrot.slane %v1832_v25, 4 }
 0x17f   : > { %v1732_v31 = vrot.slane %v1731_v26, 2  ;;  %v1834_v33 = vadd.f32 %v1833_v30, %v1832_v25 }
 0x181   : > { %v1733_v34 = vadd.f32 %v1732_v31, %v1731_v26  ;;  %v1835_v38 = vrot.slane %v1834_v33, 2 }
 0x183   : > { %v1734_v39 = vrot.slane %v1733_v34, 1  ;;  %v1836_v41 = vadd.f32 %v1835_v38, %v1834_v33 }
 0x185   : > { %v1735_v42 = vadd.f32 %v1734_v39, %v1733_v34  ;;  %v1837_v46 = vrot.slane %v1836_v41, 1 }
 0x187   : > { %1737 = vst.msk [vmem:[%s281_s11] sm:$0x1] %vm1736_vm4, %v1735_v42  ;;  %v1838_v47 = vadd.f32 %v1837_v46, %v1836_v41 }
 0x189   : > { %1839 = vst.msk [vmem:[%s281_s11 + $0x1] sm:$0x1] %vm1736_vm4, %v1838_v47 }
 0x18a   : > { %2657 = shalt.err (!%p2654_p5)
}
 0x18b   : > { %s2658_s30 = scalar_lea.hbm %s3481_s21, 32  ;;  %s2662_s7 = scalar_lea.hbm %s3532_s4, 64 }
 0x18c   : > { %p2659_p6 = scmp.ne.s32.totalorder %s3481_s21, %s2658_s30  ;;  %p2663_p10 = scmp.lt.u32.totalorder %s3481_s21, %s3532_s4 }
 0x18d   : > { %p2664_p11 = scmp.lt.u32.totalorder %s2662_s7, %s2658_s30  ;;  %p2666_p13 = scmp.lt.u32.totalorder %s2658_s30, %s3481_s21 }
 0x18e   : > { %p2660_p7 = pnand %p2659_p6, %p2790_p4 }
 0x18f   : > { %p2665_p12 = por %p2664_p11, %p2663_p10 }
 0x190   : > { %p2661_p9 = pneg %p2660_p7 }
 0x191   : > { %p2667_p0 = por %p2666_p13, %p2665_p12 }
 0x193   : > { %p2668_p1 = pnand %p2667_p0, %p2661_p9 }
 0x195   : > { %2671 = shalt.err (!%p2668_p1)
}
 0x196   : > { %2588 = dma.vmem_to_hbm [thread:$0]  (%p2790_p4), %s3483_s12, 32, %s3481_s21, %s1850_s22  }
 0x197 PF: > { %p2595_p2 = scmp.ge.s32.totalorder %s2722_s20, 2  ;;  %s1891_s10 = sand.u32 1, %s2702_s15  }
 0x198   : > { %s1892_s11 = scalar_lea.sflag [#allocation3], %s1891_s10 }
 0x199   : > { %p2591_p3 = pnand %p2595_p2, %p2797_p8 }
 0x19b   : > { %2697 = dma.done.wait (!%p2591_p3), %s1892_s11, 32  }
 0x19c   : > { %2699 = vsyncadd (!%p2591_p3), %s1892_s11, 4294967264  ;;  %s18_s20 = sadd.s32 1, %s2722_s20   ;;  %s3557_s15 = smov %s2706_s16 }
 0x19d   : > { %p15_p5 = scmp.ge.s32.totalorder %s18_s20, 4   ;;  %s3558_s16 = smov %s2710_s17 }
 0x19e   : > { %s3559_s17 = smov %s2803_s28  ;;  %s3560_s18 = smov %s2718_s19 }
 0x19f   : > { %s3561_s19 = smov %s3563_s23  ;;  %17 = sbr.rel (!%p15_p5) target bundleno = 4 (0x4), region = 85 }
 0x1a6   :  { %1897 = vsyncpa [#allocation3], 1 }
 0x1a7   :  { %1899 = vsyncpa [#allocation3 + $0x1], 1 }

</bundles_post_ra>
